<compile_context>
chip_gen: v6e
topology: v6e:2x2x1
jax: 0.10.0
libtpu: 0.0.40
codegen_flags: <defaults>
</compile_context>

<pallas_src>
import functools

import jax
import jax.numpy as jnp
from jax.experimental import pallas as pl
from jax.experimental.pallas import tpu as pltpu


def _layer_norm(y, gamma, beta, eps):
    mu = jnp.mean(y, axis=-1, keepdims=True)
    var = jnp.mean((y - mu) * (y - mu), axis=-1, keepdims=True)
    return (y - mu) * jax.lax.rsqrt(var + eps) * gamma + beta


# ---------------------------------------------------------------------------
# Pallas kernel: one query tile of one batch element, full block fused.
# ---------------------------------------------------------------------------
def transformer_block_kernel(
    x_ref,                # (1, S, E)   bf16  (full sequence: K/V need all rows)
    wqkv_ref, bqkv_ref,   # (E, 3E) bf16, (1, 3E) f32   fused Q/K/V projection
    wo_ref, bo_ref,       # (E, E) bf16,  (1, E) f32
    w1_ref, b1_ref,       # (E, H) bf16,  (1, H) f32
    w2_ref, b2_ref,       # (H, E) bf16,  (1, E) f32
    g1_ref, be1_ref,      # (1, E) f32    LayerNorm 1 gamma/beta
    g2_ref, be2_ref,      # (1, E) f32    LayerNorm 2 gamma/beta
    o_ref,                # (1, Tq, E) f32
    kv_scratch,           # (S, 2E) bf16  persistent K/V cache (per batch element)
    *, num_heads, eps, block_q, block_h,
):
    S = x_ref.shape[1]
    E = x_ref.shape[2]
    H = w1_ref.shape[1]
    dh = E // num_heads
    scale = 1.0 / (dh ** 0.5)

    qi = pl.program_id(1)
    q_start = pl.multiple_of(qi * block_q, block_q)

    # ---- K/V projection for the full sequence: compute once per batch row ----
    @pl.when(qi == 0)
    def _():
        x_full = x_ref[0]                                # (S, E)  bf16
        kv = jnp.dot(x_full, wqkv_ref[:, E:3 * E],
                     preferred_element_type=jnp.float32) + bqkv_ref[0, E:3 * E]
        kv_scratch[...] = kv.astype(jnp.bfloat16)

    x_q = x_ref[0, pl.ds(q_start, block_q), :]           # (Tq, E) bf16

    # ---- Q projection for this tile (scale folded in) ----
    q = jnp.dot(x_q, wqkv_ref[:, 0:E],
                preferred_element_type=jnp.float32) + bqkv_ref[0, 0:E]
    q = (q * scale).astype(jnp.bfloat16)

    k = kv_scratch[:, 0:E]                               # (S, E)  bf16
    v = kv_scratch[:, E:2 * E]                           # (S, E)  bf16

    # causal mask for this query tile (global positions)
    q_pos = q_start + jax.lax.broadcasted_iota(jnp.int32, (block_q, S), 0)
    k_pos = jax.lax.broadcasted_iota(jnp.int32, (block_q, S), 1)
    causal = k_pos <= q_pos

    # ---- per-head attention, output projection fused into the accumulation ----
    acc = jnp.zeros((block_q, E), jnp.float32)
    for h in range(num_heads):                           # static unrolled loop
        lo, hi = h * dh, (h + 1) * dh
        qh = q[:, lo:hi]
        kh = k[:, lo:hi]
        vh = v[:, lo:hi]
        # Q @ K^T without materializing a transpose (contract last dims).
        s = jax.lax.dot_general(qh, kh, (((1,), (1,)), ((), ())),
                                preferred_element_type=jnp.float32)   # (Tq, S)
        s = jnp.where(causal, s, jnp.float32(-1e9))
        m = jnp.max(s, axis=-1, keepdims=True)
        p = jnp.exp(s - m)                                            # f32
        l = jnp.sum(p, axis=-1, keepdims=True)
        o_h = jnp.dot(p.astype(jnp.bfloat16), vh,
                      preferred_element_type=jnp.float32)             # (Tq, dh)
        o_h = o_h * pl.reciprocal(l, approx=True)    # normalize after P@V (EUP)
        # fused output projection — no concat across heads.
        acc = acc + jnp.dot(o_h.astype(jnp.bfloat16), wo_ref[lo:hi, :],
                            preferred_element_type=jnp.float32)
    attn = acc + bo_ref[0]

    # ---- residual + LayerNorm 1 (f32) ----
    y = _layer_norm(x_q.astype(jnp.float32) + attn, g1_ref[0], be1_ref[0], eps)

    # ---- FFN (Linear -> ReLU -> Linear), hidden dim processed in chunks ----
    y16 = y.astype(jnp.bfloat16)
    ffn = jnp.zeros((block_q, E), jnp.float32)
    for hs in range(0, H, block_h):                      # static chunk loop
        he = min(hs + block_h, H)
        h1 = jnp.dot(y16, w1_ref[:, hs:he],
                     preferred_element_type=jnp.float32) + b1_ref[0, hs:he]
        h1 = jnp.maximum(h1, 0.0).astype(jnp.bfloat16)
        ffn = ffn + jnp.dot(h1, w2_ref[hs:he, :],
                            preferred_element_type=jnp.float32)
    ffn = ffn + b2_ref[0]

    # ---- residual + LayerNorm 2 (f32) ----
    z = _layer_norm(y + ffn, g2_ref[0], be2_ref[0], eps)
    o_ref[0] = z.astype(o_ref.dtype)


# ---------------------------------------------------------------------------
# Wrapper
# ---------------------------------------------------------------------------
def _vmem_limit_bytes(S, E, H, block_q):
    # rough working-set estimate (bf16 weights double-buffered + KV scratch +
    # f32 intermediates) with headroom, clamped to a range safe on v5e/v6e/v7x.
    weight_bytes = (4 * E * E + 2 * E * H) * 2           # bf16 weights (fused qkv)
    bias_bytes = (3 * E + 6 * E + H) * 4
    x_bytes = S * E * 2
    kv_scratch_bytes = S * 2 * E * 2
    act_bytes = (S * 2 * E + block_q * S + block_q * (6 * E + H)) * 4
    est = (2 * (weight_bytes + bias_bytes + x_bytes + block_q * E * 4)
           + kv_scratch_bytes + act_bytes)
    return int(min(max(4 * est, 16 * 1024 * 1024), 40 * 1024 * 1024))


def transformer_block(x, params, *, num_heads, eps=1e-5, block_q=None, block_h=512):
    B, S, E = x.shape
    H = params["w1"].shape[1]

    if block_q is None:
        block_q = S if S <= 128 else 128
    assert S % block_q == 0, "sequence length must be divisible by the query tile"
    num_q = S // block_q
    block_h = min(block_h, H)

    to_bf16 = lambda a: a.astype(jnp.bfloat16)
    to_f32 = lambda a: a.astype(jnp.float32)

    # Host-side packing: fused (E, 3E) QKV weight + (1, 3E) bias.
    wqkv = to_bf16(jnp.concatenate([params["wq"], params["wk"], params["wv"]], axis=1))
    bqkv = to_f32(jnp.concatenate([params["bq"], params["bk"], params["bv"]], axis=1))

    kernel = functools.partial(transformer_block_kernel, num_heads=num_heads,
                               eps=eps, block_q=block_q, block_h=block_h)

    const = lambda shape: pl.BlockSpec(shape, lambda b, qi: (0, 0))

    return pl.pallas_call(
        kernel,
        out_shape=jax.ShapeDtypeStruct((B, S, E), jnp.float32),
        grid_spec=pltpu.PrefetchScalarGridSpec(
            num_scalar_prefetch=0,
            grid=(B, num_q),
            in_specs=[
                pl.BlockSpec((1, S, E), lambda b, qi: (b, 0, 0)),   # x (full seq)
                const((E, 3 * E)), const((1, 3 * E)),               # wqkv, bqkv
                const((E, E)), const((1, E)),                       # wo, bo
                const((E, H)), const((1, H)),                       # w1, b1
                const((H, E)), const((1, E)),                       # w2, b2
                const((1, E)), const((1, E)),                       # gamma1, beta1
                const((1, E)), const((1, E)),                       # gamma2, beta2
            ],
            out_specs=pl.BlockSpec((1, block_q, E), lambda b, qi: (b, qi, 0)),
            scratch_shapes=[pltpu.VMEM((S, 2 * E), jnp.bfloat16)],  # KV cache
        ),
        compiler_params=pltpu.CompilerParams(
            # q-tile axis must be "arbitrary" so the KV scratch written at
            # qi == 0 is always visible to later tiles of the same batch row.
            dimension_semantics=("parallel", "arbitrary"),
            vmem_limit_bytes=_vmem_limit_bytes(S, E, H, block_q),
        ),
    )(
        x.astype(jnp.bfloat16),
        wqkv, bqkv,
        to_bf16(params["wo"]), to_f32(params["bo"]),
        to_bf16(params["w1"]), to_f32(params["b1"]),
        to_bf16(params["w2"]), to_f32(params["b2"]),
        to_f32(params["g1"]), to_f32(params["be1"]),
        to_f32(params["g2"]), to_f32(params["be2"]),
    )


# ---------------------------------------------------------------------------
# Pure-JAX reference (f32, for correctness check)
# ---------------------------------------------------------------------------
def transformer_block_ref(x, params, *, num_heads, eps=1e-5):
    B, S, E = x.shape
    dh = E // num_heads
    scale = 1.0 / (dh ** 0.5)

    def ln(y, g, b):
        mu = jnp.mean(y, -1, keepdims=True)
        var = jnp.mean((y - mu) ** 2, -1, keepdims=True)
        return (y - mu) / jnp.sqrt(var + eps) * g[0] + b[0]

    q = x @ params["wq"] + params["bq"][0]
    k = x @ params["wk"] + params["bk"][0]
    v = x @ params["wv"] + params["bv"][0]
    q = q.reshape(B, S, num_heads, dh).transpose(0, 2, 1, 3)
    k = k.reshape(B, S, num_heads, dh).transpose(0, 2, 1, 3)
    v = v.reshape(B, S, num_heads, dh).transpose(0, 2, 1, 3)
    s = jnp.einsum("bhqd,bhkd->bhqk", q, k) * scale
    mask = jnp.tril(jnp.ones((S, S), bool))
    s = jnp.where(mask, s, -1e9)
    p = jax.nn.softmax(s, axis=-1)
    attn = jnp.einsum("bhqk,bhkd->bhqd", p, v).transpose(0, 2, 1, 3).reshape(B, S, E)
    attn = attn @ params["wo"] + params["bo"][0]
    y = ln(x + attn, params["g1"], params["be1"])
    ffn = jnp.maximum(y @ params["w1"] + params["b1"][0], 0.0) @ params["w2"] + params["b2"][0]
    return ln(y + ffn, params["g2"], params["be2"])


# ---------------------------------------------------------------------------
# Main
# ---------------------------------------------------------------------------
if __name__ == "__main__":
    B, S, E, NH, H = 2, 8, 32, 4, 64   # batch, seq, embed_dim, num_heads, hidden_dim

    key = jax.random.PRNGKey(0)
    ks = jax.random.split(key, 8)

    def init_w(k, shape, std=0.05):
        return (std * jax.random.normal(k, shape)).astype(jnp.float32)

    params = {
        "wq": init_w(ks[0], (E, E)), "bq": jnp.zeros((1, E), jnp.float32),
        "wk": init_w(ks[1], (E, E)), "bk": jnp.zeros((1, E), jnp.float32),
        "wv": init_w(ks[2], (E, E)), "bv": jnp.zeros((1, E), jnp.float32),
        "wo": init_w(ks[3], (E, E)), "bo": jnp.zeros((1, E), jnp.float32),
        "w1": init_w(ks[4], (E, H)), "b1": jnp.zeros((1, H), jnp.float32),
        "w2": init_w(ks[5], (H, E)), "b2": jnp.zeros((1, E), jnp.float32),
        "g1": jnp.ones((1, E), jnp.float32), "be1": jnp.zeros((1, E), jnp.float32),
        "g2": jnp.ones((1, E), jnp.float32), "be2": jnp.zeros((1, E), jnp.float32),
    }

    x = jax.random.normal(ks[6], (B, S, E), jnp.float32)

    out = transformer_block(x, params, num_heads=NH)
    jax.block_until_ready(out)

    ref = transformer_block_ref(x, params, num_heads=NH)
    assert out.shape == (B, S, E)
    # bf16 matmuls => looser tolerance than the pure-f32 version.
    max_err = float(jnp.max(jnp.abs(out - ref)))
    assert jnp.allclose(out, ref, atol=5e-2, rtol=5e-2), f"mismatch vs reference (max err {max_err})"

    print("KERNEL_OK")
</pallas_src>

<mosaic_0001>
module attributes {stable_mosaic.version = 11 : i64} {
  func.func @transformer_block_kernel(%arg0: i32, %arg1: i32, %arg2: memref<1x8x32xbf16, #tpu.memory_space<vmem>>, %arg3: memref<32x96xbf16, #tpu.memory_space<vmem>>, %arg4: memref<1x96xf32, #tpu.memory_space<vmem>>, %arg5: memref<32x32xbf16, #tpu.memory_space<vmem>>, %arg6: memref<1x32xf32, #tpu.memory_space<vmem>>, %arg7: memref<32x64xbf16, #tpu.memory_space<vmem>>, %arg8: memref<1x64xf32, #tpu.memory_space<vmem>>, %arg9: memref<64x32xbf16, #tpu.memory_space<vmem>>, %arg10: memref<1x32xf32, #tpu.memory_space<vmem>>, %arg11: memref<1x32xf32, #tpu.memory_space<vmem>>, %arg12: memref<1x32xf32, #tpu.memory_space<vmem>>, %arg13: memref<1x32xf32, #tpu.memory_space<vmem>>, %arg14: memref<1x32xf32, #tpu.memory_space<vmem>>, %arg15: memref<1x8x32xf32, #tpu.memory_space<vmem>>, %arg16: memref<8x64xbf16, #tpu.memory_space<vmem>>) attributes {dimension_semantics = [#tpu.dimension_semantics<parallel>, #tpu.dimension_semantics<arbitrary>], iteration_bounds = array<i64: 2, 1>, scalar_prefetch = 0 : i64, scratch_operands = 1 : i64, tpu.core_type = #tpu.core_type<tc>, window_params = [{transform_indices = @transform_0, window_bounds = array<i64: 1, 8, 32>}, {pipeline_mode = #tpu.pipeline_mode<synchronous>, transform_indices = @transform_1, window_bounds = array<i64: 32, 96>}, {pipeline_mode = #tpu.pipeline_mode<synchronous>, transform_indices = @transform_2, window_bounds = array<i64: 1, 96>}, {pipeline_mode = #tpu.pipeline_mode<synchronous>, transform_indices = @transform_3, window_bounds = array<i64: 32, 32>}, {pipeline_mode = #tpu.pipeline_mode<synchronous>, transform_indices = @transform_4, window_bounds = array<i64: 1, 32>}, {pipeline_mode = #tpu.pipeline_mode<synchronous>, transform_indices = @transform_5, window_bounds = array<i64: 32, 64>}, {pipeline_mode = #tpu.pipeline_mode<synchronous>, transform_indices = @transform_6, window_bounds = array<i64: 1, 64>}, {pipeline_mode = #tpu.pipeline_mode<synchronous>, transform_indices = @transform_7, window_bounds = array<i64: 64, 32>}, {pipeline_mode = #tpu.pipeline_mode<synchronous>, transform_indices = @transform_8, window_bounds = array<i64: 1, 32>}, {pipeline_mode = #tpu.pipeline_mode<synchronous>, transform_indices = @transform_9, window_bounds = array<i64: 1, 32>}, {pipeline_mode = #tpu.pipeline_mode<synchronous>, transform_indices = @transform_10, window_bounds = array<i64: 1, 32>}, {pipeline_mode = #tpu.pipeline_mode<synchronous>, transform_indices = @transform_11, window_bounds = array<i64: 1, 32>}, {pipeline_mode = #tpu.pipeline_mode<synchronous>, transform_indices = @transform_12, window_bounds = array<i64: 1, 32>}, {transform_indices = @transform_13, window_bounds = array<i64: 1, 8, 32>}]} {
    %c8_i32 = arith.constant 8 : i32
    %0 = arith.muli %arg1, %c8_i32 : i32
    %1 = tpu.assume_multiple %0, 8 : i32
    %c0_i32 = arith.constant 0 : i32
    %2 = arith.cmpi eq, %arg1, %c0_i32 : i32
    %3 = arith.extui %2 : i1 to i32
    %c0_i32_0 = arith.constant 0 : i32
    %4 = arith.cmpi ne, %3, %c0_i32_0 : i32
    scf.if %4 {
      %c0_75 = arith.constant 0 : index
      %c0_76 = arith.constant 0 : index
      %c0_77 = arith.constant 0 : index
      %205 = vector.load %arg2[%c0_75, %c0_76, %c0_77] : memref<1x8x32xbf16, #tpu.memory_space<vmem>>, vector<1x8x32xbf16>
      %206 = vector.shape_cast %205 : vector<1x8x32xbf16> to vector<8x32xbf16>
      %c0_78 = arith.constant 0 : index
      %c32_79 = arith.constant 32 : index
      %207 = vector.load %arg3[%c0_78, %c32_79] : memref<32x96xbf16, #tpu.memory_space<vmem>>, vector<32x64xbf16>
      %cst_80 = arith.constant dense<0.000000e+00> : vector<8x64xf32>
      %208 = tpu.matmul %206, %207, %cst_80 {dimension_numbers = #tpu.dot_dimension_numbers<[1], [0], [0], [1], [0, 0, 1, 1], [], []>} : vector<8x32xbf16>, vector<32x64xbf16>, vector<8x64xf32> -> vector<8x64xf32>
      %c0_81 = arith.constant 0 : index
      %c32_82 = arith.constant 32 : index
      %209 = vector.load %arg4[%c0_81, %c32_82] : memref<1x96xf32, #tpu.memory_space<vmem>>, vector<1x64xf32>
      %210 = vector.shape_cast %209 : vector<1x64xf32> to vector<64xf32>
      %211 = vector.shape_cast %210 : vector<64xf32> to vector<1x64xf32>
      %212 = vector.broadcast %211 : vector<1x64xf32> to vector<8x64xf32>
      %213 = arith.addf %208, %212 : vector<8x64xf32>
      %214 = arith.truncf %213 : vector<8x64xf32> to vector<8x64xbf16>
      %c0_83 = arith.constant 0 : index
      %c0_84 = arith.constant 0 : index
      %215 = vector.load %arg16[%c0_83, %c0_84] : memref<8x64xbf16, #tpu.memory_space<vmem>>, vector<8x64xbf16>
      tpu.vector_store %arg16[%c0_83, %c0_84], %214 {strides = array<i32>} : memref<8x64xbf16, #tpu.memory_space<vmem>>, vector<8x64xbf16>,
    } else {
    }
    %c0 = arith.constant 0 : index
    %5 = arith.index_cast %1 : i32 to index
    %c0_1 = arith.constant 0 : index
    %6 = vector.load %arg2[%c0, %5, %c0_1] : memref<1x8x32xbf16, #tpu.memory_space<vmem>>, vector<1x8x32xbf16>
    %7 = vector.shape_cast %6 : vector<1x8x32xbf16> to vector<8x32xbf16>
    %c0_2 = arith.constant 0 : index
    %c0_3 = arith.constant 0 : index
    %8 = vector.load %arg3[%c0_2, %c0_3] : memref<32x96xbf16, #tpu.memory_space<vmem>>, vector<32x32xbf16>
    %cst = arith.constant dense<0.000000e+00> : vector<8x32xf32>
    %9 = tpu.matmul %7, %8, %cst {dimension_numbers = #tpu.dot_dimension_numbers<[1], [0], [0], [1], [0, 0, 1, 1], [], []>} : vector<8x32xbf16>, vector<32x32xbf16>, vector<8x32xf32> -> vector<8x32xf32>
    %c0_4 = arith.constant 0 : index
    %c0_5 = arith.constant 0 : index
    %10 = vector.load %arg4[%c0_4, %c0_5] : memref<1x96xf32, #tpu.memory_space<vmem>>, vector<1x32xf32>
    %11 = vector.shape_cast %10 : vector<1x32xf32> to vector<32xf32>
    %12 = vector.shape_cast %11 : vector<32xf32> to vector<1x32xf32>
    %13 = vector.broadcast %12 : vector<1x32xf32> to vector<8x32xf32>
    %14 = arith.addf %9, %13 : vector<8x32xf32>
    %cst_6 = arith.constant 0.353553385 : f32
    %15 = vector.broadcast %cst_6 : f32 to vector<8x32xf32>
    %16 = arith.mulf %14, %15 : vector<8x32xf32>
    %17 = arith.truncf %16 : vector<8x32xf32> to vector<8x32xbf16>
    %c0_7 = arith.constant 0 : index
    %c0_8 = arith.constant 0 : index
    %18 = vector.load %arg16[%c0_7, %c0_8] : memref<8x64xbf16, #tpu.memory_space<vmem>>, vector<8x32xbf16>
    %c0_9 = arith.constant 0 : index
    %c32 = arith.constant 32 : index
    %19 = vector.load %arg16[%c0_9, %c32] : memref<8x64xbf16, #tpu.memory_space<vmem>>, vector<8x32xbf16>
    %20 = tpu.iota {dimensions = array<i32: 0>} : vector<8x8xi32>
    %21 = vector.broadcast %1 : i32 to vector<8x8xi32>
    %22 = arith.addi %21, %20 : vector<8x8xi32>
    %23 = tpu.iota {dimensions = array<i32: 1>} : vector<8x8xi32>
    %24 = arith.cmpi sle, %23, %22 : vector<8x8xi32>
    %cst_10 = arith.constant 0.000000e+00 : f32
    %25 = vector.broadcast %cst_10 : f32 to vector<8x32xf32>
    %26 = vector.extract_strided_slice %17 {offsets = [0, 0], sizes = [8, 8], strides = [1, 1]} : vector<8x32xbf16> to vector<8x8xbf16>
    %27 = vector.extract_strided_slice %18 {offsets = [0, 0], sizes = [8, 8], strides = [1, 1]} : vector<8x32xbf16> to vector<8x8xbf16>
    %28 = vector.extract_strided_slice %19 {offsets = [0, 0], sizes = [8, 8], strides = [1, 1]} : vector<8x32xbf16> to vector<8x8xbf16>
    %cst_11 = arith.constant dense<0.000000e+00> : vector<8x8xf32>
    %29 = tpu.matmul %26, %27, %cst_11 {dimension_numbers = #tpu.dot_dimension_numbers<[1], [1], [0], [0], [0, 0, 1, 0], [], []>} : vector<8x8xbf16>, vector<8x8xbf16>, vector<8x8xf32> -> vector<8x8xf32>
    %cst_12 = arith.constant -1.000000e+09 : f32
    %30 = vector.broadcast %cst_12 : f32 to vector<8x8xf32>
    %31 = arith.select %24, %29, %30 : vector<8x8xi1>, vector<8x8xf32>
    %cst_13 = arith.constant dense<0xFF800000> : vector<8xf32>
    %32 = vector.multi_reduction <maximumf>, %31, %cst_13 [1] : vector<8x8xf32> to vector<8xf32>
    %33 = vector.shape_cast %32 : vector<8xf32> to vector<8x1xf32>
    %34 = vector.broadcast %33 : vector<8x1xf32> to vector<8x8xf32>
    %35 = arith.subf %31, %34 : vector<8x8xf32>
    %36 = math.exp %35 : vector<8x8xf32>
    %cst_14 = arith.constant dense<0.000000e+00> : vector<8xf32>
    %37 = vector.multi_reduction <add>, %36, %cst_14 [1] : vector<8x8xf32> to vector<8xf32>
    %38 = vector.shape_cast %37 : vector<8xf32> to vector<8x1xf32>
    %39 = arith.truncf %36 : vector<8x8xf32> to vector<8x8xbf16>
    %cst_15 = arith.constant dense<0.000000e+00> : vector<8x8xf32>
    %40 = tpu.matmul %39, %28, %cst_15 {dimension_numbers = #tpu.dot_dimension_numbers<[1], [0], [0], [1], [0, 0, 1, 1], [], []>} : vector<8x8xbf16>, vector<8x8xbf16>, vector<8x8xf32> -> vector<8x8xf32>
    %41 = tpu.reciprocal %38 {approx = true} : vector<8x1xf32> -> vector<8x1xf32>
    %42 = vector.broadcast %41 : vector<8x1xf32> to vector<8x8xf32>
    %43 = arith.mulf %40, %42 : vector<8x8xf32>
    %44 = arith.truncf %43 : vector<8x8xf32> to vector<8x8xbf16>
    %c0_16 = arith.constant 0 : index
    %c0_17 = arith.constant 0 : index
    %45 = vector.load %arg5[%c0_16, %c0_17] : memref<32x32xbf16, #tpu.memory_space<vmem>>, vector<8x32xbf16>
    %cst_18 = arith.constant dense<0.000000e+00> : vector<8x32xf32>
    %46 = tpu.matmul %44, %45, %cst_18 {dimension_numbers = #tpu.dot_dimension_numbers<[1], [0], [0], [1], [0, 0, 1, 1], [], []>} : vector<8x8xbf16>, vector<8x32xbf16>, vector<8x32xf32> -> vector<8x32xf32>
    %47 = arith.addf %25, %46 : vector<8x32xf32>
    %48 = vector.extract_strided_slice %17 {offsets = [0, 8], sizes = [8, 8], strides = [1, 1]} : vector<8x32xbf16> to vector<8x8xbf16>
    %49 = vector.extract_strided_slice %18 {offsets = [0, 8], sizes = [8, 8], strides = [1, 1]} : vector<8x32xbf16> to vector<8x8xbf16>
    %50 = vector.extract_strided_slice %19 {offsets = [0, 8], sizes = [8, 8], strides = [1, 1]} : vector<8x32xbf16> to vector<8x8xbf16>
    %cst_19 = arith.constant dense<0.000000e+00> : vector<8x8xf32>
    %51 = tpu.matmul %48, %49, %cst_19 {dimension_numbers = #tpu.dot_dimension_numbers<[1], [1], [0], [0], [0, 0, 1, 0], [], []>} : vector<8x8xbf16>, vector<8x8xbf16>, vector<8x8xf32> -> vector<8x8xf32>
    %cst_20 = arith.constant -1.000000e+09 : f32
    %52 = vector.broadcast %cst_20 : f32 to vector<8x8xf32>
    %53 = arith.select %24, %51, %52 : vector<8x8xi1>, vector<8x8xf32>
    %cst_21 = arith.constant dense<0xFF800000> : vector<8xf32>
    %54 = vector.multi_reduction <maximumf>, %53, %cst_21 [1] : vector<8x8xf32> to vector<8xf32>
    %55 = vector.shape_cast %54 : vector<8xf32> to vector<8x1xf32>
    %56 = vector.broadcast %55 : vector<8x1xf32> to vector<8x8xf32>
    %57 = arith.subf %53, %56 : vector<8x8xf32>
    %58 = math.exp %57 : vector<8x8xf32>
    %cst_22 = arith.constant dense<0.000000e+00> : vector<8xf32>
    %59 = vector.multi_reduction <add>, %58, %cst_22 [1] : vector<8x8xf32> to vector<8xf32>
    %60 = vector.shape_cast %59 : vector<8xf32> to vector<8x1xf32>
    %61 = arith.truncf %58 : vector<8x8xf32> to vector<8x8xbf16>
    %cst_23 = arith.constant dense<0.000000e+00> : vector<8x8xf32>
    %62 = tpu.matmul %61, %50, %cst_23 {dimension_numbers = #tpu.dot_dimension_numbers<[1], [0], [0], [1], [0, 0, 1, 1], [], []>} : vector<8x8xbf16>, vector<8x8xbf16>, vector<8x8xf32> -> vector<8x8xf32>
    %63 = tpu.reciprocal %60 {approx = true} : vector<8x1xf32> -> vector<8x1xf32>
    %64 = vector.broadcast %63 : vector<8x1xf32> to vector<8x8xf32>
    %65 = arith.mulf %62, %64 : vector<8x8xf32>
    %66 = arith.truncf %65 : vector<8x8xf32> to vector<8x8xbf16>
    %c8 = arith.constant 8 : index
    %c0_24 = arith.constant 0 : index
    %67 = vector.load %arg5[%c8, %c0_24] : memref<32x32xbf16, #tpu.memory_space<vmem>>, vector<8x32xbf16>
    %cst_25 = arith.constant dense<0.000000e+00> : vector<8x32xf32>
    %68 = tpu.matmul %66, %67, %cst_25 {dimension_numbers = #tpu.dot_dimension_numbers<[1], [0], [0], [1], [0, 0, 1, 1], [], []>} : vector<8x8xbf16>, vector<8x32xbf16>, vector<8x32xf32> -> vector<8x32xf32>
    %69 = arith.addf %47, %68 : vector<8x32xf32>
    %70 = vector.extract_strided_slice %17 {offsets = [0, 16], sizes = [8, 8], strides = [1, 1]} : vector<8x32xbf16> to vector<8x8xbf16>
    %71 = vector.extract_strided_slice %18 {offsets = [0, 16], sizes = [8, 8], strides = [1, 1]} : vector<8x32xbf16> to vector<8x8xbf16>
    %72 = vector.extract_strided_slice %19 {offsets = [0, 16], sizes = [8, 8], strides = [1, 1]} : vector<8x32xbf16> to vector<8x8xbf16>
    %cst_26 = arith.constant dense<0.000000e+00> : vector<8x8xf32>
    %73 = tpu.matmul %70, %71, %cst_26 {dimension_numbers = #tpu.dot_dimension_numbers<[1], [1], [0], [0], [0, 0, 1, 0], [], []>} : vector<8x8xbf16>, vector<8x8xbf16>, vector<8x8xf32> -> vector<8x8xf32>
    %cst_27 = arith.constant -1.000000e+09 : f32
    %74 = vector.broadcast %cst_27 : f32 to vector<8x8xf32>
    %75 = arith.select %24, %73, %74 : vector<8x8xi1>, vector<8x8xf32>
    %cst_28 = arith.constant dense<0xFF800000> : vector<8xf32>
    %76 = vector.multi_reduction <maximumf>, %75, %cst_28 [1] : vector<8x8xf32> to vector<8xf32>
    %77 = vector.shape_cast %76 : vector<8xf32> to vector<8x1xf32>
    %78 = vector.broadcast %77 : vector<8x1xf32> to vector<8x8xf32>
    %79 = arith.subf %75, %78 : vector<8x8xf32>
    %80 = math.exp %79 : vector<8x8xf32>
    %cst_29 = arith.constant dense<0.000000e+00> : vector<8xf32>
    %81 = vector.multi_reduction <add>, %80, %cst_29 [1] : vector<8x8xf32> to vector<8xf32>
    %82 = vector.shape_cast %81 : vector<8xf32> to vector<8x1xf32>
    %83 = arith.truncf %80 : vector<8x8xf32> to vector<8x8xbf16>
    %cst_30 = arith.constant dense<0.000000e+00> : vector<8x8xf32>
    %84 = tpu.matmul %83, %72, %cst_30 {dimension_numbers = #tpu.dot_dimension_numbers<[1], [0], [0], [1], [0, 0, 1, 1], [], []>} : vector<8x8xbf16>, vector<8x8xbf16>, vector<8x8xf32> -> vector<8x8xf32>
    %85 = tpu.reciprocal %82 {approx = true} : vector<8x1xf32> -> vector<8x1xf32>
    %86 = vector.broadcast %85 : vector<8x1xf32> to vector<8x8xf32>
    %87 = arith.mulf %84, %86 : vector<8x8xf32>
    %88 = arith.truncf %87 : vector<8x8xf32> to vector<8x8xbf16>
    %c16 = arith.constant 16 : index
    %c0_31 = arith.constant 0 : index
    %89 = vector.load %arg5[%c16, %c0_31] : memref<32x32xbf16, #tpu.memory_space<vmem>>, vector<8x32xbf16>
    %cst_32 = arith.constant dense<0.000000e+00> : vector<8x32xf32>
    %90 = tpu.matmul %88, %89, %cst_32 {dimension_numbers = #tpu.dot_dimension_numbers<[1], [0], [0], [1], [0, 0, 1, 1], [], []>} : vector<8x8xbf16>, vector<8x32xbf16>, vector<8x32xf32> -> vector<8x32xf32>
    %91 = arith.addf %69, %90 : vector<8x32xf32>
    %92 = vector.extract_strided_slice %17 {offsets = [0, 24], sizes = [8, 8], strides = [1, 1]} : vector<8x32xbf16> to vector<8x8xbf16>
    %93 = vector.extract_strided_slice %18 {offsets = [0, 24], sizes = [8, 8], strides = [1, 1]} : vector<8x32xbf16> to vector<8x8xbf16>
    %94 = vector.extract_strided_slice %19 {offsets = [0, 24], sizes = [8, 8], strides = [1, 1]} : vector<8x32xbf16> to vector<8x8xbf16>
    %cst_33 = arith.constant dense<0.000000e+00> : vector<8x8xf32>
    %95 = tpu.matmul %92, %93, %cst_33 {dimension_numbers = #tpu.dot_dimension_numbers<[1], [1], [0], [0], [0, 0, 1, 0], [], []>} : vector<8x8xbf16>, vector<8x8xbf16>, vector<8x8xf32> -> vector<8x8xf32>
    %cst_34 = arith.constant -1.000000e+09 : f32
    %96 = vector.broadcast %cst_34 : f32 to vector<8x8xf32>
    %97 = arith.select %24, %95, %96 : vector<8x8xi1>, vector<8x8xf32>
    %cst_35 = arith.constant dense<0xFF800000> : vector<8xf32>
    %98 = vector.multi_reduction <maximumf>, %97, %cst_35 [1] : vector<8x8xf32> to vector<8xf32>
    %99 = vector.shape_cast %98 : vector<8xf32> to vector<8x1xf32>
    %100 = vector.broadcast %99 : vector<8x1xf32> to vector<8x8xf32>
    %101 = arith.subf %97, %100 : vector<8x8xf32>
    %102 = math.exp %101 : vector<8x8xf32>
    %cst_36 = arith.constant dense<0.000000e+00> : vector<8xf32>
    %103 = vector.multi_reduction <add>, %102, %cst_36 [1] : vector<8x8xf32> to vector<8xf32>
    %104 = vector.shape_cast %103 : vector<8xf32> to vector<8x1xf32>
    %105 = arith.truncf %102 : vector<8x8xf32> to vector<8x8xbf16>
    %cst_37 = arith.constant dense<0.000000e+00> : vector<8x8xf32>
    %106 = tpu.matmul %105, %94, %cst_37 {dimension_numbers = #tpu.dot_dimension_numbers<[1], [0], [0], [1], [0, 0, 1, 1], [], []>} : vector<8x8xbf16>, vector<8x8xbf16>, vector<8x8xf32> -> vector<8x8xf32>
    %107 = tpu.reciprocal %104 {approx = true} : vector<8x1xf32> -> vector<8x1xf32>
    %108 = vector.broadcast %107 : vector<8x1xf32> to vector<8x8xf32>
    %109 = arith.mulf %106, %108 : vector<8x8xf32>
    %110 = arith.truncf %109 : vector<8x8xf32> to vector<8x8xbf16>
    %c24 = arith.constant 24 : index
    %c0_38 = arith.constant 0 : index
    %111 = vector.load %arg5[%c24, %c0_38] : memref<32x32xbf16, #tpu.memory_space<vmem>>, vector<8x32xbf16>
    %cst_39 = arith.constant dense<0.000000e+00> : vector<8x32xf32>
    %112 = tpu.matmul %110, %111, %cst_39 {dimension_numbers = #tpu.dot_dimension_numbers<[1], [0], [0], [1], [0, 0, 1, 1], [], []>} : vector<8x8xbf16>, vector<8x32xbf16>, vector<8x32xf32> -> vector<8x32xf32>
    %113 = arith.addf %91, %112 : vector<8x32xf32>
    %c0_40 = arith.constant 0 : index
    %c0_41 = arith.constant 0 : index
    %114 = vector.load %arg6[%c0_40, %c0_41] : memref<1x32xf32, #tpu.memory_space<vmem>>, vector<1x32xf32>
    %115 = vector.shape_cast %114 : vector<1x32xf32> to vector<32xf32>
    %116 = vector.shape_cast %115 : vector<32xf32> to vector<1x32xf32>
    %117 = vector.broadcast %116 : vector<1x32xf32> to vector<8x32xf32>
    %118 = arith.addf %113, %117 : vector<8x32xf32>
    %119 = arith.extf %7 : vector<8x32xbf16> to vector<8x32xf32>
    %120 = arith.addf %119, %118 : vector<8x32xf32>
    %c0_42 = arith.constant 0 : index
    %c0_43 = arith.constant 0 : index
    %121 = vector.load %arg11[%c0_42, %c0_43] : memref<1x32xf32, #tpu.memory_space<vmem>>, vector<1x32xf32>
    %122 = vector.shape_cast %121 : vector<1x32xf32> to vector<32xf32>
    %c0_44 = arith.constant 0 : index
    %c0_45 = arith.constant 0 : index
    %123 = vector.load %arg12[%c0_44, %c0_45] : memref<1x32xf32, #tpu.memory_space<vmem>>, vector<1x32xf32>
    %124 = vector.shape_cast %123 : vector<1x32xf32> to vector<32xf32>
    %cst_46 = arith.constant dense<0.000000e+00> : vector<8xf32>
    %125 = vector.multi_reduction <add>, %120, %cst_46 [1] : vector<8x32xf32> to vector<8xf32>
    %126 = vector.shape_cast %125 : vector<8xf32> to vector<8x1xf32>
    %cst_47 = arith.constant 3.200000e+01 : f32
    %127 = vector.broadcast %cst_47 : f32 to vector<8x1xf32>
    %128 = arith.divf %126, %127 : vector<8x1xf32>
    %129 = vector.broadcast %128 : vector<8x1xf32> to vector<8x32xf32>
    %130 = arith.subf %120, %129 : vector<8x32xf32>
    %131 = vector.broadcast %128 : vector<8x1xf32> to vector<8x32xf32>
    %132 = arith.subf %120, %131 : vector<8x32xf32>
    %133 = arith.mulf %130, %132 : vector<8x32xf32>
    %cst_48 = arith.constant dense<0.000000e+00> : vector<8xf32>
    %134 = vector.multi_reduction <add>, %133, %cst_48 [1] : vector<8x32xf32> to vector<8xf32>
    %135 = vector.shape_cast %134 : vector<8xf32> to vector<8x1xf32>
    %cst_49 = arith.constant 3.200000e+01 : f32
    %136 = vector.broadcast %cst_49 : f32 to vector<8x1xf32>
    %137 = arith.divf %135, %136 : vector<8x1xf32>
    %138 = vector.broadcast %128 : vector<8x1xf32> to vector<8x32xf32>
    %139 = arith.subf %120, %138 : vector<8x32xf32>
    %cst_50 = arith.constant 9.99999974E-6 : f32
    %140 = vector.broadcast %cst_50 : f32 to vector<8x1xf32>
    %141 = arith.addf %137, %140 : vector<8x1xf32>
    %142 = math.rsqrt %141 : vector<8x1xf32>
    %143 = vector.broadcast %142 : vector<8x1xf32> to vector<8x32xf32>
    %144 = arith.mulf %139, %143 : vector<8x32xf32>
    %145 = vector.shape_cast %122 : vector<32xf32> to vector<1x32xf32>
    %146 = vector.broadcast %145 : vector<1x32xf32> to vector<8x32xf32>
    %147 = arith.mulf %144, %146 : vector<8x32xf32>
    %148 = vector.shape_cast %124 : vector<32xf32> to vector<1x32xf32>
    %149 = vector.broadcast %148 : vector<1x32xf32> to vector<8x32xf32>
    %150 = arith.addf %147, %149 : vector<8x32xf32>
    %151 = arith.truncf %150 : vector<8x32xf32> to vector<8x32xbf16>
    %cst_51 = arith.constant 0.000000e+00 : f32
    %152 = vector.broadcast %cst_51 : f32 to vector<8x32xf32>
    %c0_52 = arith.constant 0 : index
    %c0_53 = arith.constant 0 : index
    %153 = vector.load %arg7[%c0_52, %c0_53] : memref<32x64xbf16, #tpu.memory_space<vmem>>, vector<32x64xbf16>
    %cst_54 = arith.constant dense<0.000000e+00> : vector<8x64xf32>
    %154 = tpu.matmul %151, %153, %cst_54 {dimension_numbers = #tpu.dot_dimension_numbers<[1], [0], [0], [1], [0, 0, 1, 1], [], []>} : vector<8x32xbf16>, vector<32x64xbf16>, vector<8x64xf32> -> vector<8x64xf32>
    %c0_55 = arith.constant 0 : index
    %c0_56 = arith.constant 0 : index
    %155 = vector.load %arg8[%c0_55, %c0_56] : memref<1x64xf32, #tpu.memory_space<vmem>>, vector<1x64xf32>
    %156 = vector.shape_cast %155 : vector<1x64xf32> to vector<64xf32>
    %157 = vector.shape_cast %156 : vector<64xf32> to vector<1x64xf32>
    %158 = vector.broadcast %157 : vector<1x64xf32> to vector<8x64xf32>
    %159 = arith.addf %154, %158 : vector<8x64xf32>
    %cst_57 = arith.constant 0.000000e+00 : f32
    %160 = vector.broadcast %cst_57 : f32 to vector<8x64xf32>
    %161 = arith.maximumf %159, %160 : vector<8x64xf32>
    %162 = arith.truncf %161 : vector<8x64xf32> to vector<8x64xbf16>
    %c0_58 = arith.constant 0 : index
    %c0_59 = arith.constant 0 : index
    %163 = vector.load %arg9[%c0_58, %c0_59] : memref<64x32xbf16, #tpu.memory_space<vmem>>, vector<64x32xbf16>
    %cst_60 = arith.constant dense<0.000000e+00> : vector<8x32xf32>
    %164 = tpu.matmul %162, %163, %cst_60 {dimension_numbers = #tpu.dot_dimension_numbers<[1], [0], [0], [1], [0, 0, 1, 1], [], []>} : vector<8x64xbf16>, vector<64x32xbf16>, vector<8x32xf32> -> vector<8x32xf32>
    %165 = arith.addf %152, %164 : vector<8x32xf32>
    %c0_61 = arith.constant 0 : index
    %c0_62 = arith.constant 0 : index
    %166 = vector.load %arg10[%c0_61, %c0_62] : memref<1x32xf32, #tpu.memory_space<vmem>>, vector<1x32xf32>
    %167 = vector.shape_cast %166 : vector<1x32xf32> to vector<32xf32>
    %168 = vector.shape_cast %167 : vector<32xf32> to vector<1x32xf32>
    %169 = vector.broadcast %168 : vector<1x32xf32> to vector<8x32xf32>
    %170 = arith.addf %165, %169 : vector<8x32xf32>
    %171 = arith.addf %150, %170 : vector<8x32xf32>
    %c0_63 = arith.constant 0 : index
    %c0_64 = arith.constant 0 : index
    %172 = vector.load %arg13[%c0_63, %c0_64] : memref<1x32xf32, #tpu.memory_space<vmem>>, vector<1x32xf32>
    %173 = vector.shape_cast %172 : vector<1x32xf32> to vector<32xf32>
    %c0_65 = arith.constant 0 : index
    %c0_66 = arith.constant 0 : index
    %174 = vector.load %arg14[%c0_65, %c0_66] : memref<1x32xf32, #tpu.memory_space<vmem>>, vector<1x32xf32>
    %175 = vector.shape_cast %174 : vector<1x32xf32> to vector<32xf32>
    %cst_67 = arith.constant dense<0.000000e+00> : vector<8xf32>
    %176 = vector.multi_reduction <add>, %171, %cst_67 [1] : vector<8x32xf32> to vector<8xf32>
    %177 = vector.shape_cast %176 : vector<8xf32> to vector<8x1xf32>
    %cst_68 = arith.constant 3.200000e+01 : f32
    %178 = vector.broadcast %cst_68 : f32 to vector<8x1xf32>
    %179 = arith.divf %177, %178 : vector<8x1xf32>
    %180 = vector.broadcast %179 : vector<8x1xf32> to vector<8x32xf32>
    %181 = arith.subf %171, %180 : vector<8x32xf32>
    %182 = vector.broadcast %179 : vector<8x1xf32> to vector<8x32xf32>
    %183 = arith.subf %171, %182 : vector<8x32xf32>
    %184 = arith.mulf %181, %183 : vector<8x32xf32>
    %cst_69 = arith.constant dense<0.000000e+00> : vector<8xf32>
    %185 = vector.multi_reduction <add>, %184, %cst_69 [1] : vector<8x32xf32> to vector<8xf32>
    %186 = vector.shape_cast %185 : vector<8xf32> to vector<8x1xf32>
    %cst_70 = arith.constant 3.200000e+01 : f32
    %187 = vector.broadcast %cst_70 : f32 to vector<8x1xf32>
    %188 = arith.divf %186, %187 : vector<8x1xf32>
    %189 = vector.broadcast %179 : vector<8x1xf32> to vector<8x32xf32>
    %190 = arith.subf %171, %189 : vector<8x32xf32>
    %cst_71 = arith.constant 9.99999974E-6 : f32
    %191 = vector.broadcast %cst_71 : f32 to vector<8x1xf32>
    %192 = arith.addf %188, %191 : vector<8x1xf32>
    %193 = math.rsqrt %192 : vector<8x1xf32>
    %194 = vector.broadcast %193 : vector<8x1xf32> to vector<8x32xf32>
    %195 = arith.mulf %190, %194 : vector<8x32xf32>
    %196 = vector.shape_cast %173 : vector<32xf32> to vector<1x32xf32>
    %197 = vector.broadcast %196 : vector<1x32xf32> to vector<8x32xf32>
    %198 = arith.mulf %195, %197 : vector<8x32xf32>
    %199 = vector.shape_cast %175 : vector<32xf32> to vector<1x32xf32>
    %200 = vector.broadcast %199 : vector<1x32xf32> to vector<8x32xf32>
    %201 = arith.addf %198, %200 : vector<8x32xf32>
    %c0_72 = arith.constant 0 : index
    %c0_73 = arith.constant 0 : index
    %c0_74 = arith.constant 0 : index
    %202 = vector.load %arg15[%c0_72, %c0_73, %c0_74] : memref<1x8x32xf32, #tpu.memory_space<vmem>>, vector<1x8x32xf32>
    %203 = vector.shape_cast %202 : vector<1x8x32xf32> to vector<8x32xf32>
    %204 = vector.shape_cast %201 : vector<8x32xf32> to vector<1x8x32xf32>
    tpu.vector_store %arg15[%c0_72, %c0_73, %c0_74], %204 {strides = array<i32>} : memref<1x8x32xf32, #tpu.memory_space<vmem>>, vector<1x8x32xf32>,
    return
  }
  func.func @transform_0(%arg0: i32, %arg1: i32) -> (i32, i32, i32) {
    %c0_i32 = arith.constant 0 : i32
    %c0_i32_0 = arith.constant 0 : i32
    %c0_i32_1 = arith.constant 0 : i32
    return %arg0, %c0_i32, %c0_i32_0 : i32, i32, i32
  }
  func.func @transform_1(%arg0: i32, %arg1: i32) -> (i32, i32) {
    %c0_i32 = arith.constant 0 : i32
    %c0_i32_0 = arith.constant 0 : i32
    %c0_i32_1 = arith.constant 0 : i32
    return %c0_i32, %c0_i32_0 : i32, i32
  }
  func.func @transform_2(%arg0: i32, %arg1: i32) -> (i32, i32) {
    %c0_i32 = arith.constant 0 : i32
    %c0_i32_0 = arith.constant 0 : i32
    %c0_i32_1 = arith.constant 0 : i32
    return %c0_i32, %c0_i32_0 : i32, i32
  }
  func.func @transform_3(%arg0: i32, %arg1: i32) -> (i32, i32) {
    %c0_i32 = arith.constant 0 : i32
    %c0_i32_0 = arith.constant 0 : i32
    %c0_i32_1 = arith.constant 0 : i32
    return %c0_i32, %c0_i32_0 : i32, i32
  }
  func.func @transform_4(%arg0: i32, %arg1: i32) -> (i32, i32) {
    %c0_i32 = arith.constant 0 : i32
    %c0_i32_0 = arith.constant 0 : i32
    %c0_i32_1 = arith.constant 0 : i32
    return %c0_i32, %c0_i32_0 : i32, i32
  }
  func.func @transform_5(%arg0: i32, %arg1: i32) -> (i32, i32) {
    %c0_i32 = arith.constant 0 : i32
    %c0_i32_0 = arith.constant 0 : i32
    %c0_i32_1 = arith.constant 0 : i32
    return %c0_i32, %c0_i32_0 : i32, i32
  }
  func.func @transform_6(%arg0: i32, %arg1: i32) -> (i32, i32) {
    %c0_i32 = arith.constant 0 : i32
    %c0_i32_0 = arith.constant 0 : i32
    %c0_i32_1 = arith.constant 0 : i32
    return %c0_i32, %c0_i32_0 : i32, i32
  }
  func.func @transform_7(%arg0: i32, %arg1: i32) -> (i32, i32) {
    %c0_i32 = arith.constant 0 : i32
    %c0_i32_0 = arith.constant 0 : i32
    %c0_i32_1 = arith.constant 0 : i32
    return %c0_i32, %c0_i32_0 : i32, i32
  }
  func.func @transform_8(%arg0: i32, %arg1: i32) -> (i32, i32) {
    %c0_i32 = arith.constant 0 : i32
    %c0_i32_0 = arith.constant 0 : i32
    %c0_i32_1 = arith.constant 0 : i32
    return %c0_i32, %c0_i32_0 : i32, i32
  }
  func.func @transform_9(%arg0: i32, %arg1: i32) -> (i32, i32) {
    %c0_i32 = arith.constant 0 : i32
    %c0_i32_0 = arith.constant 0 : i32
    %c0_i32_1 = arith.constant 0 : i32
    return %c0_i32, %c0_i32_0 : i32, i32
  }
  func.func @transform_10(%arg0: i32, %arg1: i32) -> (i32, i32) {
    %c0_i32 = arith.constant 0 : i32
    %c0_i32_0 = arith.constant 0 : i32
    %c0_i32_1 = arith.constant 0 : i32
    return %c0_i32, %c0_i32_0 : i32, i32
  }
  func.func @transform_11(%arg0: i32, %arg1: i32) -> (i32, i32) {
    %c0_i32 = arith.constant 0 : i32
    %c0_i32_0 = arith.constant 0 : i32
    %c0_i32_1 = arith.constant 0 : i32
    return %c0_i32, %c0_i32_0 : i32, i32
  }
  func.func @transform_12(%arg0: i32, %arg1: i32) -> (i32, i32) {
    %c0_i32 = arith.constant 0 : i32
    %c0_i32_0 = arith.constant 0 : i32
    %c0_i32_1 = arith.constant 0 : i32
    return %c0_i32, %c0_i32_0 : i32, i32
  }
  func.func @transform_13(%arg0: i32, %arg1: i32) -> (i32, i32, i32) {
    %c0_i32 = arith.constant 0 : i32
    %c0_i32_0 = arith.constant 0 : i32
    return %arg0, %arg1, %c0_i32 : i32, i32, i32
  }
}

</mosaic_0001>

<bundles_post_ra>
// kernel: tpu_custom_call.1
= control target key start
LH: loop header
LB: loop body
LE: loop exit
PB: predicated region body
PF: predicated region fallthrough
CT: control target
= control target key end

     0   :  { %s2427_s0 = inlined_call_operand.hbm [shape: bf16[2,8,32], index: 0, kind: input, shape index: {}]   ;;  %s2428_s1 = inlined_call_operand.vmem [shape: bf16[32,96], index: 1, kind: input, shape index: {}]   ;;  %s2429_s2 = inlined_call_operand.vmem [shape: f32[1,96], index: 2, kind: input, shape index: {}]   ;;  %s2430_s3 = inlined_call_operand.vmem [shape: bf16[32,32], index: 3, kind: input, shape index: {}]   ;;  %s2431_s4 = inlined_call_operand.vmem [shape: f32[1,32], index: 4, kind: input, shape index: {}]   ;;  %s2432_s5 = inlined_call_operand.vmem [shape: bf16[32,64], index: 5, kind: input, shape index: {}]   ;;  %s2433_s6 = inlined_call_operand.vmem [shape: f32[1,64], index: 6, kind: input, shape index: {}]   ;;  %s2434_s7 = inlined_call_operand.vmem [shape: bf16[64,32], index: 7, kind: input, shape index: {}]   ;;  %s2435_s8 = inlined_call_operand.vmem [shape: f32[1,32], index: 8, kind: input, shape index: {}]   ;;  %s2436_s9 = inlined_call_operand.vmem [shape: f32[1,32], index: 9, kind: input, shape index: {}]   ;;  %s2437_s10 = inlined_call_operand.vmem [shape: f32[1,32], index: 10, kind: input, shape index: {}]   ;;  %s2438_s11 = inlined_call_operand.vmem [shape: f32[1,32], index: 11, kind: input, shape index: {}]   ;;  %s2439_s12 = inlined_call_operand.vmem [shape: f32[1,32], index: 12, kind: input, shape index: {}]   ;;  %s2440_s13 = inlined_call_operand.hbm [shape: f32[2,8,32], index: 13, kind: output, shape index: {}]  }
   0x1   :  { %2444 = sst [smem:[#allocation12_spill]] %s2427_s0 }
   0x2   :  { %2445 = sst [smem:[#allocation13_spill]] %s2428_s1 }
   0x3   :  { %2446 = sst [smem:[#allocation14_spill]] %s2429_s2 }
   0x4   :  { %2447 = sst [smem:[#allocation15_spill]] %s2438_s11 }
   0x5   :  { %2448 = sst [smem:[#allocation16_spill]] %s2439_s12 }
   0x6   :  { %2449 = sst [smem:[#allocation17_spill]] %s2440_s13 }
   0x7   :  { %18 = vsyncpa [#allocation4], 0 }
   0x8   :  { %20 = vsyncpa [#allocation4 + $0x1], 0 }
   0x9   :  { %21 = vsyncpa [#allocation5], 0 }
   0xa   :  { %23 = vsyncpa [#allocation5 + $0x1], 0  ;;  %s2082_s25 = smov 0   ;;  %s2084_s26 = smov 0  }
   0xb   :  { %s2086_s27 = smov 0   ;;  %s2088_s28 = smov 0  }
   0xc   :  { %s2090_s29 = smov 0   ;;  %s2092_s30 = smov 0  }
   0xd LB: > { %2450 = sst [smem:[#allocation9_spill]] %s1979_s25  ;;  %s1594_s14 = sadd.s32 4294967295, %s1999_s30   ;;  %s1999_s30 = sphi %s2092_s30, %s29_s30   ;;  %s1995_s29 = sphi %s2090_s29, %s2473_s29   ;;  %s1991_s28 = sphi %s2088_s28, %s2472_s28   ;;  %s1987_s27 = sphi %s2086_s27, %s2471_s27   ;;  %s1983_s26 = sphi %s2084_s26, %s2470_s26   ;;  %s1979_s25 = sphi %s2082_s25, %s2469_s25  }
   0xe   : > { %s1595_s15 = sadd.s32 4294967294, %s1999_s30   ;;  %s41_s16 = sadd.s32 1, %s1995_s29 }
   0xf   : > { %s48_s17 = sadd.s32 1, %s1987_s27  ;;  %p43_p0 = scmp.ge.s32.totalorder %s41_s16, 2 }
  0x10   : > { %p55_p1 = scmp.ne.s32.totalorder %s1987_s27, %s1983_s26  ;;  %p56_p2 = scmp.eq.s32.totalorder %s1999_s30, 0 }
  0x11   : > { %p61_p3 = scmp.ne.s32.totalorder %s1983_s26, %s1979_s25  ;;  %s2475_s16 = smov (%p43_p0, %s41_s16), 0 }
  0x12   : > { %2451 = sst [smem:[#allocation10_spill]] %s2475_s16  ;;  %p2123_p4 = por %p56_p2, %p55_p1 }
  0x13   : > { %p62_p5 = scmp.eq.s32.totalorder %s1594_s14, 0  ;;  %s45_s19 = ssub.s32 %s1995_s29, %s2475_s16 }
  0x14   : > { %p339_p6 = scmp.eq.s32.totalorder %s1594_s14, 1  ;;  %p46_p7 = scmp.eq.s32.totalorder %s45_s19, 0 }
  0x15   : > { %p2129_p8 = por %p62_p5, %p61_p3  ;;  %p345_p10 = scmp.eq.s32.totalorder %s1595_s15, 1 }
  0x16   : > { %p2133_p9 = por %p339_p6, %p55_p1  ;;  %p1801_p13 = scmp.lt.s32.totalorder %s1999_s30, 2 }
  0x17   : > { %s2138_s22 = scalar_select %p46_p7, %s1987_s27, %s48_s17  }
  0x18   : > { %p2140_p11 = por %p345_p10, %p61_p3  ;;  %s401_s24 = sand.u32 1, %s1987_s27  }
  0x19   : > { %2455 = sst [smem:[#allocation11_spill]] %s2138_s22  ;;  %s1598_s14 = sshll.u32 %s401_s24, 2 }
  0x1a   : > { %s2456_s23 = scalar_select %p2140_p11, 1, 0 }
  0x1b   : > { %s1599_s19 = sshll.u32 %s1995_s29, 6  ;;  %s2457_s0 = sld [smem:[#allocation12_spill]] }
  0x1c   : > { %s405_s12 = scalar_lea.vmem [#allocation3], %s1598_s14  ;;  %p2153_p0 = pnand %p1801_p13, %p2123_p4 }
  0x1d   : > { %s412_s11 = sshll.u32 %s405_s12, 4  ;;  %p1600_p1 = scmp.ge.s32.totalorder %s1999_s30, 1  ;;  %s413_s11 = int_to_ptr.vmem [resolvable:$true] %s412_s11 }
  0x1e   : > { %p417_p2 = scmp.lt.s32.totalorder %s1999_s30, 3  ;;  %s402_s17 = scalar_lea.sflag [#allocation4], %s401_s24 }
  0x1f   : > { %p1893_p3 = pneg %p2153_p0  ;;  %s1904_s22 = scalar_lea.vmem %s413_s11, 64 }
  0x20   : > { %p1905_p5 = scmp.ne.s32.totalorder %s413_s11, %s1904_s22  ;;  %s2001_s25 = smov [#allocation3]  }
  0x21   : > { %s410_s13 = scalar_lea.hbm %s2457_s0, %s1599_s19  ;;  %s1909_s16 = sshll.u32 %s2001_s25, 4  ;;  %s1910_s16 = int_to_ptr.vmem [resolvable:$false] %s1909_s16 }
  0x22   : > { %p1907_p6 = pnand %p1905_p5, %p1893_p3  ;;  %s1911_s12 = scalar_lea.vmem %s1910_s16, 128 }
  0x23   : > { %p1912_p10 = scmp.lt.s32.totalorder %s413_s11, %s1910_s16  ;;  %p1913_p12 = scmp.lt.s32.totalorder %s1911_s12, %s1904_s22 }
  0x24   : > { %p1908_p7 = pneg %p1907_p6 }
  0x25   : > { %p1914_p4 = por %p1913_p12, %p1912_p10 }
  0x27   : > { %p1915_p13 = pnand %p1914_p4, %p1908_p7 }
  0x29   : > { %1918 = shalt.err (!%p1915_p13)
}
  0x2a   : > { %1796 = dma.hbm_to_vmem [thread:$0]  (!%p2153_p0), %s410_s13, 64, %s413_s11, %s402_s17  }
  0x2b   : > { %p418_p11 = pnand %p1600_p1, %p417_p2 }
  0x2c   : > { %s2168_s18 = sand.u32 (!%p418_p11), 1, %s1983_s26  }
  0x2d   : > { %421 = sbr.rel (%p418_p11) target bundleno = 3205 (0xc85), region = 72  ;;  %s1601_s24 = sshll.u32 (!%p418_p11), %s2168_s18, 2 }
  0x2e   : > { %s424_s22 = scalar_lea.sflag (!%p418_p11), [#allocation4], %s2168_s18  ;;  %s2172_s14 = scalar_lea.vmem (!%p418_p11), [#allocation3], %s1601_s24 }
  0x32   : > { %1970 = dma.done.wait (%p2129_p8), %s424_s22, 64  }
  0x33   : > { %1972 = vsyncadd (%p2129_p8), %s424_s22, 4294967232  ;;  %v2002_v0 = vmov 0.0   ;;  %vm2003_vm0 = vmmov 0   ;;  %s2459_s1 = sld [smem:[#allocation13_spill]]  ;;  %s2004_s19 = smov 96   ;;  %vm506_vm1 = vcmask 261120   ;;  %v628_v30 = vlaneseq }
  0x34   : > { %1681 = vmatprep.subr.bf16.mxu0 %v2002_v0  ;;  %1685 = vmatprep.mubr.msk.bf16.mxu0 %vm2003_vm0, %v2002_v0  ;;  %s2460_s2 = sld [smem:[#allocation14_spill]]  ;;  %v2204_v6 = vld [vmem:[%s2172_s14] sm:$0xf]  ;;  %s2005_s11 = smov 120   ;;  %vm551_vm2 = vcmask 519168   ;;  %vm635_vm3 = vcmask 64512  }
  0x35   : > { %1689 = vmatprep.subr.bf16.mxu1 %v2002_v0  ;;  %1693 = vmatprep.mubr.msk.bf16.mxu1 %vm2003_vm0, %v2002_v0  ;;  %v476_v9 = vld [vmem:[%s2172_s14] sm:$0xf]  ;;  %v2234_v31 = vshrl.u32 %v628_v30, 7  ;;  %v2236_v32 = vand.u32 127, %v628_v30  ;;  %s2006_s14 = smov 88   ;;  %s2007_s13 = smov 112  }
  0x36   : > { %s2008_s20 = smov 104   ;;  %vm701_vm5 = vcmask 1043456   ;;  %v748_v61 = vld [vmem:[%s2430_s3] sm:$0xf]  ;;  %v862_v63 = vld [vmem:[%s2430_s3 + $0x4] sm:$0xf] }
  0x37   : > { %vm634_vm4 = vcmp.le.s32.totalorder %v2236_v32, %v2234_v31  ;;  %v913_v62 = vsel %vm701_vm5, %v748_v61, 0  ;;  %s2009_s16 = smov 80   ;;  %s2010_s22 = smov 72   ;;  %vm1423_vm6 = vcmask 523264  }
  0x38   : > { %s2462_s17 = sld [smem:[#allocation16_spill]]  ;;  %s1640_s25 = sshll.u32 %s1991_s28, 7 }
  0x39   : > { %v1860_v1 = vld [vmem:[%s2459_s1 + $0x8] sm:$0xff]   ;;  %v1861_v2 = vld [vmem:[%s2459_s1] sm:$0xff]   ;;  %s2463_s0 = sld [smem:[#allocation17_spill]] }
  0x3a   : > { %499 = vrot.lane.b32.xlu0 %v1860_v1, %s2004_s19  ;;  %v1862_v3 = vld [vmem:[%s2459_s1 + $0x8] sm:$0xff]   ;;  %v1863_v4 = vld [vmem:[%s2459_s1] sm:$0xff]   ;;  %v867_v1 = vsel %vm701_vm5, %v862_v63, 0 }
  0x3b   : > { %v1603_v5 = vld [vmem:[%s2460_s2] ss:$0 sm:$0xff]  ;;  %1690 = vmatpush3.bf16.msra.mxu1 %v1862_v3  ;;  %s1499_s2 = scalar_lea.sflag [#allocation5], %s2168_s18 }
  0x3c   : > { %503 = vrot.lane.b32.xlu1 %v1603_v5, %s2004_s19  ;;  %1691 = vmatprep.subr.bf16.mxu1 %v2002_v0 }
  0x3e   : > { %497 = vrot.lane.b32.xlu0 %v1861_v2, %s2004_s19 }
  0x3f   : > { %1692 = vmatpush3.bf16.msra.mxu1 %v1863_v4  ;;  %s1511_s1 = scalar_lea.hbm %s2463_s0, %s1640_s25 }
  0x40   : > { %1703 = vmatprep.subr.bf16.mxu1 %v2002_v0 }
  0x42   : > { %1694 = vmatmul.mubr.msk.bf16.vlgmr.msra.gmra.mxu1 %vm506_vm1, %v2204_v6 }
  0x43   : > { %1705 = vmatprep.mubr.msk.bf16.mxu1 %vm2003_vm0, %v2002_v0 }
  0xac   : > { %v500_v7 = vpop.permute.xlu0 %499 }
  0xad   : > { %1682 = vmatpush3.bf16.msra.mxu0 %v500_v7 }
  0xae   : > { %1683 = vmatprep.subr.bf16.mxu0 %v2002_v0  ;;  %v504_v17 = vpop.permute.xlu1 %503 }
  0xb0   : > { %v498_v8 = vpop.permute.xlu0 %497 }
  0xb1   : > { %1684 = vmatpush3.bf16.msra.mxu0 %v498_v8 }
  0xb2   : > { %1697 = vmatprep.subr.bf16.mxu0 %v2002_v0 }
  0xb4   : > { %1686 = vmatmul.mubr.msk.bf16.vlgmr.msra.gmra.mxu0 %vm506_vm1, %v476_v9 }
  0xb5   : > { %1699 = vmatprep.mubr.msk.bf16.mxu0 %vm2003_vm0, %v2002_v0 }
 0x102   : > { %v619_v10 = vpop.f32.mrf.mxu1 }
 0x103   : > { %v620_v11 = vadd.f32 %v1603_v5, %v619_v10 }
 0x104   : > { %v1695_v12 = vpop.f32.mrf.mxu1 }
 0x105   : > { %v625_v13 = vmul.f32 0.35355338, %v620_v11 }
 0x106   : > { %v622_v14 = vpop.f32.mrf.mxu1 }
 0x107   : > { %v2217_v15 = vpack.c.bf16 %v625_v13, %v625_v13 }
 0x108   : > { %v1696_v16 = vpop.f32.mrf.mxu1 }
 0x109   : > { %750 = vrot.lane.b32.xlu0 %v2217_v15, %s2005_s11 }
 0x174   : > { %v544_v18 = vpop.f32.mrf.mxu0 }
 0x175   : > { %v545_v19 = vadd.f32 %v544_v18, %v504_v17 }
 0x176   : > { %v1687_v20 = vpop.f32.mrf.mxu0 }
 0x177   : > { %v550_v21 = vpack.c.bf16 %v545_v19, %v545_v19 }
 0x178   : > { %v547_v22 = vpop.f32.mrf.mxu0 }
 0x179   : > { %552 = vst.msk [vmem:[#allocation2] sm:$0xf] %vm551_vm2, %v550_v21 }
 0x17a   : > { %v1688_v23 = vpop.f32.mrf.mxu0 }
 0x17b   : > { %v751_v29 = vpop.permute.xlu0 %750 }
 0x180   : > { %v627_v24 = vld [vmem:[#allocation2] sm:$0xf] }
 0x181   : > { %v640_v25 = vsel %vm635_vm3, %v627_v24, 0  ;;  %v2221_v26 = vcombine.low %v627_v24, %v627_v24 }
 0x182   : > { %1698 = vmatpush3.bf16.xpose.msra.mxu0 %v640_v25 }
 0x183   : > { %752 = vrot.lane.b32.xlu1 %v2221_v26, %s2005_s11  ;;  %1709 = vmatprep.subr.bf16.mxu0 %v2002_v0  ;;  %s1602_s11 = sshll.u32 %s2168_s18, 3 }
 0x189   : > { %1700 = vmatmul.mubr.msk.bf16.vlgmr.msra.gmra.mxu0 %vm635_vm3, %v2217_v15 }
 0x18a   : > { %1711 = vmatprep.mubr.msk.bf16.mxu0 %vm2003_vm0, %v2002_v0 }
 0x1f5   : > { %v753_v27 = vpop.permute.xlu1 %752 }
 0x1f6   : > { %v758_v28 = vsel %vm635_vm3, %v753_v27, 0 }
 0x1f7   : > { %1710 = vmatpush3.bf16.xpose.msra.mxu0 %v758_v28 }
 0x1f8   : > { %1721 = vmatprep.subr.bf16.mxu0 %v2002_v0 }
 0x1fe   : > { %1712 = vmatmul.mubr.msk.bf16.vlgmr.msra.gmra.mxu0 %vm635_vm3, %v751_v29 }
 0x1ff   : > { %1723 = vmatprep.mubr.msk.bf16.mxu0 %vm2003_vm0, %v2002_v0  ;;  %1722 = vmatpush3.bf16.msra.mxu0 %v867_v1 }
 0x200   : > { %1733 = vmatprep.subr.bf16.mxu0 %v2002_v0 }
 0x249   : > { %v676_v33 = vpop.f32.mrf.mxu0 }
 0x24a   : > { %v682_v34 = vsel %vm634_vm4, %v676_v33, -1e+09 }
 0x24b   : > { %v1701_v35 = vpop.f32.mrf.mxu0  ;;  %v683_v36 = vsel %vm635_vm3, %v682_v34, -inf }
 0x24c   : > { %684 = vmax.xlane.f32.xlu1 %v683_v36 }
 0x24d   : > { %v679_v37 = vpop.f32.mrf.mxu0 }
 0x24f   : > { %v1702_v38 = vpop.f32.mrf.mxu0 }
 0x25d   : > { %811 = vrot.lane.b32.xlu1 %v2221_v26, %s2006_s14 }
 0x2be   : > { %v794_v39 = vpop.f32.mrf.mxu0 }
 0x2bf   : > { %v800_v40 = vsel %vm634_vm4, %v794_v39, -1e+09 }
 0x2c0   : > { %v1713_v41 = vpop.f32.mrf.mxu0  ;;  %v801_v42 = vsel %vm635_vm3, %v800_v40, -inf }
 0x2c1   : > { %802 = vmax.xlane.f32.xlu0 %v801_v42 }
 0x2c2   : > { %v797_v43 = vpop.f32.mrf.mxu0 }
 0x2c4   : > { %v1714_v44 = vpop.f32.mrf.mxu0 }
 0x2d5   : > { %v685_v45 = vpop.xlane.xlu1 %684 }
 0x2d6   : > { %v686_v46 = vsub.f32 %v682_v34, %v685_v45 }
 0x2d7   : > { %696 = vrot.lane.b32.xlu0 %v2221_v26, %s2004_s19 }
 0x2d8   : > { %v687_v47 = vmul.f32 1.442695, %v686_v46 }
 0x2d9   : > { %v812_v55 = vpop.permute.xlu1 %811 }
 0x2da   : > { %1871 = vpow2.f32 %v687_v47  ;;  %v817_v57 = vsel %vm701_vm5, %v812_v55, 0 }
 0x2db   : > { %957 = vrot.lane.b32.xlu0 %v2221_v26, %s2007_s13 }
 0x2df   : > { %955 = vrot.lane.b32.xlu0 %v2217_v15, %s2007_s13  ;;  %s2011_s13 = smov [#allocation6]  }
 0x2e7   : > { %v1872_v48 = vpop.eup %1871 }
 0x2e8   : > { %v689_v49 = vsel %vm635_vm3, %v1872_v48, 0.0  ;;  %v692_v56 = vpack.c.bf16 %v1872_v48, %v1872_v48 }
 0x2fe   : > { %690 = vadd.xlane.f32.xlu0 %v689_v49 }
 0x314   : > { %1117 = vrot.lane.b32.xlu0 %v2221_v26, %s2008_s20 }
 0x34a   : > { %v803_v50 = vpop.xlane.xlu0 %802 }
 0x34b   : > { %v804_v51 = vsub.f32 %v800_v40, %v803_v50 }
 0x34d   : > { %v805_v52 = vmul.f32 1.442695, %v804_v51  ;;  %v1067_v51 = vld [vmem:[%s2430_s3 + $0x8] sm:$0xf] }
 0x34e   : > { %v697_v53 = vpop.permute.xlu0 %696 }
 0x34f   : > { %1873 = vpow2.f32 %v805_v52  ;;  %v703_v54 = vsel %vm701_vm5, %v697_v53, 0  ;;  %v1072_v52 = vsel %vm701_vm5, %v1067_v51, 0 }
 0x350   : > { %1704 = vmatpush3.bf16.msra.mxu1 %v703_v54 }
 0x351   : > { %1715 = vmatprep.subr.bf16.mxu1 %v2002_v0 }
 0x352   : > { %v958_v2 = vpop.permute.xlu0 %957 }
 0x353   : > { %1706 = vmatmul.mubr.msk.bf16.vlgmr.msra.gmra.mxu1 %vm635_vm3, %v692_v56  ;;  %v963_v21 = vsel %vm635_vm3, %v958_v2, 0 }
 0x354   : > { %1716 = vmatpush3.bf16.msra.mxu1 %v817_v57  ;;  %1717 = vmatprep.mubr.msk.bf16.mxu1 %vm2003_vm0, %v2002_v0 }
 0x355   : > { %1727 = vmatprep.subr.bf16.mxu1 %v2002_v0 }
 0x356   : > { %v956_v3 = vpop.permute.xlu0 %955 }
 0x35c   : > { %v1874_v58 = vpop.eup %1873 }
 0x35d   : > { %v807_v59 = vsel %vm635_vm3, %v1874_v58, 0.0  ;;  %v810_v60 = vpack.c.bf16 %v1874_v58, %v1874_v58 }
 0x35e   : > { %808 = vadd.xlane.f32.xlu1 %v807_v59 }
 0x35f   : > { %1718 = vmatmul.mubr.msk.bf16.vlgmr.msra.gmra.mxu1 %vm635_vm3, %v810_v60 }
 0x360   : > { %1729 = vmatprep.mubr.msk.bf16.mxu1 %vm2003_vm0, %v2002_v0  ;;  %1728 = vmatpush3.bf16.msra.mxu1 %v913_v62 }
 0x361   : > { %1739 = vmatprep.subr.bf16.mxu1 %v2002_v0 }
 0x387   : > { %v691_v4 = vpop.xlane.xlu0 %690 }
 0x388   : > { %1875 = vrcp.f32 %v691_v4 }
 0x38b   : > { %v1118_v47 = vpop.permute.xlu0 %1117 }
 0x38c   : > { %v1123_v50 = vsel %vm635_vm3, %v1118_v47, 0 }
 0x395   : > { %v1876_v7 = vpop.eup %1875 }
 0x3e7   : > { %v809_v5 = vpop.xlane.xlu1 %808 }
 0x3e8   : > { %1877 = vrcp.f32 %v809_v5 }
 0x3f5   : > { %v1878_v14 = vpop.eup %1877 }
 0x413   : > { %v739_v8 = vpop.f32.mrf.mxu1 }
 0x414   : > { %v746_v9 = vmul.f32 %v1876_v7, %v739_v8 }
 0x415   : > { %v1707_v10 = vpop.f32.mrf.mxu1 }
 0x416   : > { %v747_v11 = vpack.c.bf16 %v746_v9, %v746_v9 }
 0x417   : > { %v742_v12 = vpop.f32.mrf.mxu1 }
 0x418   : > { %1730 = vmatmul.mubr.msk.bf16.vlgmr.msra.gmra.mxu1 %vm635_vm3, %v747_v11 }
 0x419   : > { %v1708_v13 = vpop.f32.mrf.mxu1  ;;  %1741 = vmatprep.mubr.msk.bf16.mxu1 %vm2003_vm0, %v2002_v0 }
 0x41f   : > { %v853_v16 = vpop.f32.mrf.mxu1 }
 0x420   : > { %v860_v17 = vmul.f32 %v1878_v14, %v853_v16 }
 0x421   : > { %v1719_v18 = vpop.f32.mrf.mxu1 }
 0x422   : > { %v861_v19 = vpack.c.bf16 %v860_v17, %v860_v17 }
 0x423   : > { %v856_v20 = vpop.f32.mrf.mxu1 }
 0x424   : > { %1724 = vmatmul.mubr.msk.bf16.vlgmr.msra.gmra.mxu0 %vm635_vm3, %v861_v19 }
 0x425   : > { %1734 = vmatpush3.bf16.xpose.msra.mxu0 %v963_v21  ;;  %v1720_v22 = vpop.f32.mrf.mxu1  ;;  %1735 = vmatprep.mubr.msk.bf16.mxu0 %vm2003_vm0, %v2002_v0 }
 0x426   : > { %1745 = vmatprep.subr.bf16.mxu0 %v2002_v0 }
 0x42c   : > { %1736 = vmatmul.mubr.msk.bf16.vlgmr.msra.gmra.mxu0 %vm635_vm3, %v956_v3 }
 0x42d   : > { %1747 = vmatprep.mubr.msk.bf16.mxu0 %vm2003_vm0, %v2002_v0  ;;  %1746 = vmatpush3.bf16.msra.mxu0 %v1072_v52  ;;  %v1626_v52 = vld [vmem:[%s2437_s10] ss:$0 sm:$0xff] }
 0x42e   : > { %1757 = vmatprep.subr.bf16.mxu0 %v2002_v0 }
 0x4d8   : > { %v949_v23 = vpop.f32.mrf.mxu1 }
 0x4da   : > { %v1731_v24 = vpop.f32.mrf.mxu1 }
 0x4dc   : > { %v952_v25 = vpop.f32.mrf.mxu1 }
 0x4de   : > { %v1732_v27 = vpop.f32.mrf.mxu1 }
 0x4e4   : > { %v903_v28 = vpop.f32.mrf.mxu0 }
 0x4e5   : > { %v2288_v29 = vadd.f32 %v949_v23, %v903_v28  ;;  %v1624_v28 = vld [vmem:[%s2431_s4] ss:$0 sm:$0xff] }
 0x4e6   : > { %v1725_v30 = vpop.f32.mrf.mxu0 }
 0x4e7   : > { %v1283_v30 = vunpack.c.l.bf16 %v2204_v6  ;;  %v1866_v6 = vld [vmem:[%s2432_s5] sm:$0xff]  }
 0x4e8   : > { %v906_v33 = vpop.f32.mrf.mxu0 }
 0x4ea   : > { %v1726_v34 = vpop.f32.mrf.mxu0 }
 0x4ec   : > { %v999_v35 = vpop.f32.mrf.mxu0 }
 0x4ed   : > { %v1005_v36 = vsel %vm634_vm4, %v999_v35, -1e+09 }
 0x4ee   : > { %v1737_v37 = vpop.f32.mrf.mxu0  ;;  %v1006_v38 = vsel %vm635_vm3, %v1005_v36, -inf }
 0x4ef   : > { %1007 = vmax.xlane.f32.xlu1 %v1006_v38 }
 0x4f0   : > { %v1002_v39 = vpop.f32.mrf.mxu0 }
 0x4f2   : > { %v1738_v40 = vpop.f32.mrf.mxu0 }
 0x500   : > { %1016 = vrot.lane.b32.xlu1 %v2221_v26, %s2009_s16  ;;  %s469_s16 = scalar_lea.vmem [#allocation6], %s1602_s11 }
 0x501   : > { %s1513_s12 = sshll.u32 %s469_s16, 4  ;;  %s1514_s12 = int_to_ptr.vmem [resolvable:$true] %s1513_s12 }
 0x502   : > { %s1919_s14 = scalar_lea.vmem %s1514_s12, 128 }
 0x503   : > { %p1920_p8 = scmp.ne.s32.totalorder %s1514_s12, %s1919_s14 }
 0x504   : > { %1115 = vrot.lane.b32.xlu1 %v2217_v15, %s2008_s20  ;;  %s2461_s20 = sld [smem:[#allocation15_spill]] }
 0x505   : > { %p1921_p11 = pnand %p1920_p8, %p2133_p9 }
 0x507   : > { %p1922_p12 = pneg %p1921_p11 }
 0x578   : > { %v1008_v41 = vpop.xlane.xlu1 %1007 }
 0x579   : > { %v1009_v42 = vsub.f32 %v1005_v36, %v1008_v41 }
 0x57b   : > { %v1010_v43 = vmul.f32 1.442695, %v1009_v42 }
 0x57c   : > { %v1017_v44 = vpop.permute.xlu1 %1016 }
 0x57d   : > { %1879 = vpow2.f32 %v1010_v43  ;;  %v1022_v45 = vsel %vm701_vm5, %v1017_v44, 0  ;;  %v1865_v44 = vld [vmem:[%s2432_s5 + $0x8] sm:$0xff]  }
 0x57e   : > { %1740 = vmatpush3.bf16.msra.mxu1 %v1022_v45  ;;  %v1867_v45 = vld [vmem:[%s2434_s7 + $0x18] sm:$0xff]  }
 0x57f   : > { %1751 = vmatprep.subr.bf16.mxu1 %v2002_v0 }
 0x580   : > { %v1116_v15 = vpop.permute.xlu1 %1115 }
 0x58a   : > { %v1880_v46 = vpop.eup %1879 }
 0x58b   : > { %v1012_v48 = vsel %vm635_vm3, %v1880_v46, 0.0  ;;  %v1015_v49 = vpack.c.bf16 %v1880_v46, %v1880_v46  ;;  %v1868_v46 = vld [vmem:[%s2434_s7 + $0x10] sm:$0xff]  }
 0x58c   : > { %1013 = vadd.xlane.f32.xlu1 %v1012_v48 }
 0x58d   : > { %1742 = vmatmul.mubr.msk.bf16.vlgmr.msra.gmra.mxu1 %vm635_vm3, %v1015_v49 }
 0x58e   : > { %1752 = vmatpush3.bf16.xpose.msra.mxu1 %v1123_v50  ;;  %1753 = vmatprep.mubr.msk.bf16.mxu1 %vm2003_vm0, %v2002_v0 }
 0x58f   : > { %1763 = vmatprep.subr.bf16.mxu1 %v2002_v0 }
 0x595   : > { %1754 = vmatmul.mubr.msk.bf16.vlgmr.msra.gmra.mxu1 %vm635_vm3, %v1116_v15  ;;  %v1625_v15 = vld [vmem:[%s2436_s9] ss:$0 sm:$0xff] }
 0x596   : > { %1765 = vmatprep.mubr.msk.bf16.mxu1 %vm2003_vm0, %v2002_v0 }
 0x615   : > { %v1014_v53 = vpop.xlane.xlu1 %1013 }
 0x616   : > { %1881 = vrcp.f32 %v1014_v53 }
 0x623   : > { %v1882_v54 = vpop.eup %1881 }
 0x64d   : > { %v1058_v55 = vpop.f32.mrf.mxu1 }
 0x64e   : > { %v1065_v56 = vmul.f32 %v1882_v54, %v1058_v55 }
 0x64f   : > { %v1743_v57 = vpop.f32.mrf.mxu1 }
 0x650   : > { %v1066_v58 = vpack.c.bf16 %v1065_v56, %v1065_v56  ;;  %v1869_v56 = vld [vmem:[%s2434_s7 + $0x8] sm:$0xff]   ;;  %v1870_v57 = vld [vmem:[%s2434_s7] sm:$0xff]  }
 0x651   : > { %v1061_v59 = vpop.f32.mrf.mxu1 }
 0x652   : > { %1748 = vmatmul.mubr.msk.bf16.vlgmr.msra.gmra.mxu0 %vm635_vm3, %v1066_v58  ;;  %v1627_v58 = vld [vmem:[%s2433_s6] ss:$0 sm:$0xff] }
 0x653   : > { %v1744_v60 = vpop.f32.mrf.mxu1  ;;  %1759 = vmatprep.mubr.msk.bf16.mxu0 %vm2003_vm0, %v2002_v0 }
 0x655   : > { %v1159_v61 = vpop.f32.mrf.mxu1 }
 0x656   : > { %v1165_v62 = vsel %vm634_vm4, %v1159_v61, -1e+09 }
 0x657   : > { %v1755_v63 = vpop.f32.mrf.mxu1  ;;  %v1166_v1 = vsel %vm635_vm3, %v1165_v62, -inf }
 0x658   : > { %1167 = vmax.xlane.f32.xlu0 %v1166_v1 }
 0x659   : > { %v1162_v2 = vpop.f32.mrf.mxu1 }
 0x65b   : > { %v1756_v3 = vpop.f32.mrf.mxu1 }
 0x66e   : > { %1176 = vrot.lane.b32.xlu0 %v2221_v26, %s2010_s22  ;;  %v1227_v26 = vld [vmem:[%s2430_s3 + $0xc] sm:$0xf] }
 0x66f   : > { %v1232_v11 = vsel %vm701_vm5, %v1227_v26, 0 }
 0x670   : > { %1764 = vmatpush3.bf16.msra.mxu1 %v1232_v11 }
 0x671   : > { %1777 = vmatprep.subr.bf16.mxu1 %v2002_v0 }
 0x6e1   : > { %v1168_v4 = vpop.xlane.xlu0 %1167 }
 0x6e2   : > { %v1169_v5 = vsub.f32 %v1165_v62, %v1168_v4 }
 0x6e4   : > { %v1170_v7 = vmul.f32 1.442695, %v1169_v5 }
 0x6e5   : > { %v1177_v8 = vpop.permute.xlu0 %1176 }
 0x6e6   : > { %1883 = vpow2.f32 %v1170_v7  ;;  %v1182_v9 = vsel %vm701_vm5, %v1177_v8, 0 }
 0x6e7   : > { %1758 = vmatpush3.bf16.msra.mxu0 %v1182_v9 }
 0x6e8   : > { %1769 = vmatprep.subr.bf16.mxu0 %v2002_v0 }
 0x6f3   : > { %v1884_v31 = vpop.eup %1883 }
 0x6f4   : > { %v1172_v32 = vsel %vm635_vm3, %v1884_v31, 0.0  ;;  %v1175_v10 = vpack.c.bf16 %v1884_v31, %v1884_v31 }
 0x6f5   : > { %1173 = vadd.xlane.f32.xlu1 %v1172_v32 }
 0x6f6   : > { %1760 = vmatmul.mubr.msk.bf16.vlgmr.msra.gmra.mxu0 %vm635_vm3, %v1175_v10 }
 0x6f7   : > { %1773 = vmatprep.mubr.msk.bf16.mxu0 %vm2003_vm0, %v2002_v0  ;;  %1770 = vmatpush3.bf16.msra.mxu0 %v1865_v44 }
 0x6f8   : > { %1771 = vmatprep.subr.bf16.mxu0 %v2002_v0 }
 0x6fb   : > { %1772 = vmatpush3.bf16.msra.mxu0 %v1866_v6 }
 0x712   : > { %v1108_v12 = vpop.f32.mrf.mxu0 }
 0x713   : > { %v1114_v13 = vadd.f32 %v1108_v12, %v2288_v29 }
 0x714   : > { %v1749_v14 = vpop.f32.mrf.mxu0 }
 0x716   : > { %v1111_v16 = vpop.f32.mrf.mxu0 }
 0x718   : > { %v1750_v17 = vpop.f32.mrf.mxu0 }
 0x77e   : > { %v1174_v18 = vpop.xlane.xlu1 %1173 }
 0x77f   : > { %1885 = vrcp.f32 %v1174_v18  ;;  %v1637_v18 = vld [vmem:[%s2461_s20] ss:$0 sm:$0xff]  ;;  %s1923_s20 = sshll.u32 %s2011_s13, 4  ;;  %s1924_s20 = int_to_ptr.vmem [resolvable:$false] %s1923_s20 }
 0x780   : > { %s1925_s28 = scalar_lea.vmem %s1924_s20, 256  ;;  %p1926_p0 = scmp.lt.s32.totalorder %s1514_s12, %s1924_s20 }
 0x781   : > { %p1927_p1 = scmp.lt.s32.totalorder %s1925_s28, %s1919_s14 }
 0x783   : > { %p1928_p2 = por %p1927_p1, %p1926_p0 }
 0x785   : > { %p1929_p3 = pnand %p1928_p2, %p1922_p12 }
 0x78c   : > { %v1886_v19 = vpop.eup %1885 }
 0x7b6   : > { %v1218_v20 = vpop.f32.mrf.mxu0 }
 0x7b7   : > { %v1225_v21 = vmul.f32 %v1886_v19, %v1218_v20  ;;  %v1638_v20 = vld [vmem:[%s2462_s17] ss:$0 sm:$0xff] }
 0x7b8   : > { %v1761_v22 = vpop.f32.mrf.mxu0 }
 0x7b9   : > { %v1226_v23 = vpack.c.bf16 %v1225_v21, %v1225_v21 }
 0x7ba   : > { %v1221_v24 = vpop.f32.mrf.mxu0 }
 0x7bb   : > { %1766 = vmatmul.mubr.msk.bf16.vlgmr.msra.gmra.mxu1 %vm635_vm3, %v1226_v23 }
 0x7bc   : > { %v1762_v25 = vpop.f32.mrf.mxu0  ;;  %1785 = vmatprep.mubr.msk.bf16.mxu1 %vm2003_vm0, %v2002_v0  ;;  %1778 = vmatpush3.bf16.msra.mxu1 %v1867_v45 }
 0x7bd   : > { %1779 = vmatprep.subr.bf16.mxu1 %v2002_v0 }
 0x7c0   : > { %1780 = vmatpush3.bf16.msra.mxu1 %v1868_v46 }
 0x7c1   : > { %1781 = vmatprep.subr.bf16.mxu1 %v2002_v0 }
 0x7c4   : > { %1782 = vmatpush3.bf16.msra.mxu1 %v1869_v56 }
 0x7c5   : > { %1783 = vmatprep.subr.bf16.mxu1 %v2002_v0  ;;  %v1631_v0 = vld [vmem:[%s2435_s8] ss:$0 sm:$0xff] }
 0x7c8   : > { %1784 = vmatpush3.bf16.msra.mxu1 %v1870_v57 }
 0x87b   : > { %v1268_v27 = vpop.f32.mrf.mxu1 }
 0x87c   : > { %v1274_v29 = vadd.f32 %v1268_v27, %v1114_v13 }
 0x87d   : > { %v1767_v33 = vpop.f32.mrf.mxu1 }
 0x87e   : > { %v1282_v34 = vadd.f32 %v1624_v28, %v1274_v29 }
 0x87f   : > { %v1271_v35 = vpop.f32.mrf.mxu1 }
 0x880   : > { %v1284_v36 = vadd.f32 %v1283_v30, %v1282_v34 }
 0x881   : > { %v1768_v37 = vpop.f32.mrf.mxu1 }
 0x882   : > { %v1287_v38 = vsel %vm506_vm1, %v1284_v36, 0.0 }
 0x883   : > { %1288 = vadd.xlane.f32.xlu1 %v1287_v38 }
 0x90c   : > { %v1289_v39 = vpop.xlane.xlu1 %1288 }
 0x90d   : > { %v1291_v40 = vmul.f32 0.03125, %v1289_v39 }
 0x90f   : > { %v1292_v41 = vsub.f32 %v1284_v36, %v1291_v40 }
 0x911   : > { %v1293_v42 = vmul.f32 %v1292_v41, %v1292_v41 }
 0x913   : > { %v1294_v43 = vsel %vm506_vm1, %v1293_v42, 0.0 }
 0x914   : > { %1295 = vadd.xlane.f32.xlu1 %v1294_v43 }
 0x99d   : > { %v1296_v47 = vpop.xlane.xlu1 %1295 }
 0x99e   : > { %v1297_v48 = vmul.f32 0.03125, %v1296_v47 }
 0x9a0   : > { %v1298_v49 = vadd.f32 1e-05, %v1297_v48 }
 0x9a2   : > { %1887 = vrsqrt.f32 %v1298_v49 }
 0x9af   : > { %v1888_v50 = vpop.eup %1887 }
 0x9b0   : > { %v1300_v51 = vmul.f32 %v1888_v50, %v1292_v41 }
 0x9b2   : > { %v1307_v53 = vmul.f32 %v1625_v15, %v1300_v51 }
 0x9b4   : > { %v1314_v54 = vadd.f32 %v1626_v52, %v1307_v53 }
 0x9b6   : > { %v1315_v55 = vpack.c.bf16 %v1314_v54, %v1314_v54 }
 0x9b8   : > { %1774 = vmatmul.mubr.msk.bf16.vlgmr.msra.gmra.mxu0 %vm506_vm1, %v1315_v55 }
 0xa78   : > { %v1376_v59 = vpop.f32.mrf.mxu0 }
 0xa79   : > { %v1377_v60 = vadd.f32 %v1627_v58, %v1376_v59 }
 0xa7a   : > { %v1775_v61 = vpop.f32.mrf.mxu0 }
 0xa7b   : > { %v1382_v62 = vmax.f32 %v1377_v60, 0.0 }
 0xa7c   : > { %v1379_v63 = vpop.f32.mrf.mxu0 }
 0xa7d   : > { %v1383_v1 = vpack.c.bf16 %v1382_v62, %v1382_v62 }
 0xa7e   : > { %v1776_v2 = vpop.f32.mrf.mxu0 }
 0xa7f   : > { %1786 = vmatmul.mubr.msk.bf16.vlgmr.msra.gmra.mxu1 %vm1423_vm6, %v1383_v1 }
 0xb3f   : > { %v1461_v3 = vpop.f32.mrf.mxu1 }
 0xb40   : > { %v1462_v4 = vadd.f32 %v1631_v0, %v1461_v3 }
 0xb41   : > { %v1787_v5 = vpop.f32.mrf.mxu1 }
 0xb42   : > { %v1467_v7 = vadd.f32 %v1462_v4, %v1314_v54 }
 0xb43   : > { %v1464_v8 = vpop.f32.mrf.mxu1 }
 0xb44   : > { %v1470_v9 = vsel %vm506_vm1, %v1467_v7, 0.0 }
 0xb45   : > { %1471 = vadd.xlane.f32.xlu1 %v1470_v9  ;;  %v1788_v31 = vpop.f32.mrf.mxu1 }
 0xbce   : > { %v1472_v32 = vpop.xlane.xlu1 %1471 }
 0xbcf   : > { %v1473_v10 = vmul.f32 0.03125, %v1472_v32 }
 0xbd1   : > { %v1474_v26 = vsub.f32 %v1467_v7, %v1473_v10 }
 0xbd3   : > { %v1475_v11 = vmul.f32 %v1474_v26, %v1474_v26 }
 0xbd5   : > { %v1476_v12 = vsel %vm506_vm1, %v1475_v11, 0.0 }
 0xbd6   : > { %1477 = vadd.xlane.f32.xlu1 %v1476_v12 }
 0xc5f   : > { %v1478_v13 = vpop.xlane.xlu1 %1477 }
 0xc60   : > { %v1479_v14 = vmul.f32 0.03125, %v1478_v13 }
 0xc62   : > { %v1480_v16 = vadd.f32 1e-05, %v1479_v14 }
 0xc64   : > { %1889 = vrsqrt.f32 %v1480_v16 }
 0xc71   : > { %v1890_v17 = vpop.eup %1889 }
 0xc72   : > { %v1482_v19 = vmul.f32 %v1890_v17, %v1474_v26 }
 0xc74   : > { %v1489_v21 = vmul.f32 %v1637_v18, %v1482_v19 }
 0xc76   : > { %v1496_v22 = vadd.f32 %v1638_v20, %v1489_v21 }
 0xc78   : > { %1497 = vst.msk [vmem:[%s469_s16] sm:$0xff] %vm506_vm1, %v1496_v22 }
 0xc79   : > { %1932 = shalt.err (!%p1929_p3)
}
 0xc7a   : > { %s1933_s11 = scalar_lea.hbm %s1511_s1, 128  ;;  %s1937_s15 = scalar_lea.hbm %s2463_s0, 256 }
 0xc7b   : > { %p1934_p5 = scmp.ne.s32.totalorder %s1511_s1, %s1933_s11  ;;  %p1938_p10 = scmp.lt.s32.totalorder %s1511_s1, %s2463_s0 }
 0xc7c   : > { %p1939_p4 = scmp.lt.s32.totalorder %s1937_s15, %s1933_s11 }
 0xc7d   : > { %p1935_p6 = pnand %p1934_p5, %p2133_p9 }
 0xc7e   : > { %p1940_p13 = por %p1939_p4, %p1938_p10 }
 0xc7f   : > { %p1936_p7 = pneg %p1935_p6 }
 0xc81   : > { %p1941_p8 = pnand %p1940_p13, %p1936_p7 }
 0xc83   : > { %1944 = shalt.err (!%p1941_p8)
}
 0xc84   : > { %1791 = dma.vmem_to_hbm [thread:$0]  (%p2133_p9), %s1514_s12, 128, %s1511_s1, %s1499_s2  }
 0xc85 PF: > { %s2464_s16 = sld [smem:[#allocation9_spill]]  ;;  %p2465_p11 = scmp.ne.s32.totalorder %s2456_s23, 0 }
 0xc86   : > { %p2466_p12 = scmp.ge.s32.totalorder %s1999_s30, 2 }
 0xc88   : > { %p1798_p0 = pnand %p2466_p12, %p2465_p11 }
 0xc8a   : > { %p1799_p1 = pneg %p1798_p0 }
 0xc8b   : > { %s1525_s24 = sand.u32 1, %s2464_s16  }
 0xc8c   : > { %s1526_s22 = scalar_lea.sflag [#allocation5], %s1525_s24 }
 0xc8d   : > { %1974 = dma.done.wait (%p1799_p1), %s1526_s22, 128  }
 0xc8e   : > { %1976 = vsyncadd (%p1799_p1), %s1526_s22, 4294967168  ;;  %s29_s30 = sadd.s32 1, %s1999_s30   ;;  %s2467_s14 = sld [smem:[#allocation11_spill]] }
 0xc8f   : > { %p26_p2 = scmp.ge.s32.totalorder %s29_s30, 4   ;;  %s2468_s1 = sld [smem:[#allocation10_spill]] }
 0xc90   : > { %s2469_s25 = smov %s1983_s26  ;;  %s2470_s26 = smov %s1987_s27 }
 0xc91   : > { %s2472_s28 = smov %s1995_s29  ;;  %28 = sbr.rel (!%p26_p2) target bundleno = 13 (0xd), region = 122 }
 0xc94   : > { %s2471_s27 = smov %s2467_s14 }
 0xc95   : > { %s2473_s29 = smov %s2468_s1 }
 0xc96   :  { %1531 = vsyncpa [#allocation4], 1 }
 0xc97   :  { %1533 = vsyncpa [#allocation4 + $0x1], 1 }
 0xc98   :  { %1534 = vsyncpa [#allocation5], 1 }
 0xc99   :  { %1536 = vsyncpa [#allocation5 + $0x1], 1 }

</bundles_post_ra>
